<compile_context>
chip_gen: v5e
topology: v5e:2x2
jax: 0.10.0
libtpu: 0.0.40
codegen_flags: <defaults>
</compile_context>

<pallas_src>
import functools

import jax
import jax.numpy as jnp
from jax.experimental import pallas as pl
from jax.experimental.pallas import tpu as pltpu


def bam_ca_kernel(x_ref,
                  w0_ref, b0_ref,
                  w1_ref, b1_ref,
                  w2_ref, b2_ref,
                  wl_ref, bl_ref,
                  o_ref, acc_ref, *, inv_hw, lane_groups):
    """Grid = (B tiles, HW tiles).  Accumulates the spatial sum across the HW
    (reduction) axis into a lane-shaped (tb, C, 128) scratch and runs the
    folded MLP only on the last reduction step."""
    k = pl.program_id(1)

    @pl.when(k == 0)
    def _():
        acc_ref[...] = jnp.zeros_like(acc_ref)

    # Steady state: pure VPU adds of static 128-lane slices (no XLU work,
    # no whole-block f32 materialization for sub-f32 inputs).
    part = x_ref[:, :, 0:128].astype(jnp.float32)
    for g in range(1, lane_groups):
        part = part + x_ref[:, :, g * 128:(g + 1) * 128].astype(jnp.float32)
    acc_ref[...] += part

    @pl.when(k == pl.num_programs(1) - 1)
    def _():
        # Single 128->1 cross-lane reduce + relayout, once per batch tile.
        pooled = jnp.sum(acc_ref[...], axis=-1) * inv_hw                  # (tb, C)
        # fc0..fc2 (eval-mode BN + bias folded into w/b) + ReLU
        h = jnp.maximum(jnp.dot(pooled, w0_ref[...],
                                preferred_element_type=jnp.float32) + b0_ref[...], 0.0)
        h = jnp.maximum(jnp.dot(h, w1_ref[...],
                                preferred_element_type=jnp.float32) + b1_ref[...], 0.0)
        h = jnp.maximum(jnp.dot(h, w2_ref[...],
                                preferred_element_type=jnp.float32) + b2_ref[...], 0.0)
        out = jnp.dot(h, wl_ref[...],
                      preferred_element_type=jnp.float32) + bl_ref[...]   # (tb, C)
        o_ref[:, 0, :] = out.astype(o_ref.dtype)


# ---------------------------------------------------------------------------
# Tile sizing (VMEM-budget driven; safe for v5e / v6e / v7x)
# ---------------------------------------------------------------------------
_VMEM_BUDGET_BYTES = 40 * 1024 * 1024   # total estimate cap (fits v7x 64 MiB physical)
_MAX_X_BLOCK_BYTES = 8 * 1024 * 1024    # per-buffer x block target (double-buffered)
_MAX_LANE_GROUPS = 64                   # bounds the unrolled add chain (thw <= 8192)


def _round_up(v, m):
    return -(-v // m) * m


def _pick_batch_tile(b, max_tb=8):
    """Largest divisor of b that is <= min(max_tb, b//2), so the 'parallel'
    grid axis has >= 2 programs whenever b >= 2 (both v7x TensorCores)."""
    limit = max(1, min(max_tb, b // 2 if b >= 2 else 1))
    for t in range(limit, 0, -1):
        if b % t == 0:
            return t
    return 1


def _pick_spatial_tile(hw, row_bytes, block_budget_bytes,
                       max_lane_groups=_MAX_LANE_GROUPS):
    """Pick thw (a multiple of 128) and the padded HW it evenly divides."""
    cap = min(max(block_budget_bytes // row_bytes, 128), 128 * max_lane_groups)
    cap = max(128, (cap // 128) * 128)
    if hw <= cap:                                   # single reduction step
        thw = _round_up(hw, 128)
        return thw, thw
    if hw % 128 == 0:
        # largest multiple-of-128 divisor of hw that fits the budget (no padding)
        n, best, d = hw // 128, 0, 1
        while 128 * d <= cap:
            if n % d == 0:
                best = 128 * d
            d += 1
        if best >= cap // 2:
            return best, hw
    # otherwise: split into even, 128-aligned tiles and zero-pad the tail
    n_tiles = -(-hw // cap)
    thw = _round_up(-(-hw // n_tiles), 128)
    return thw, n_tiles * thw


def bam_channel_attention(x, p, eps=1e-5, expand_output=True):
    """x: (B, C, H, W).  Returns the expanded attention map (B, C, H, W), or
    the compact (B, C) attention vector if expand_output=False."""
    B, C, H, W = x.shape
    HW = H * W
    dtype_bytes = jnp.dtype(x.dtype).itemsize

    # Fold eval-mode BatchNorm (running stats) + Linear bias into the weights:
    #   relu((x @ w + b) * scale + shift) == relu(x @ (w*scale) + (b*scale + shift))
    def fold(i):
        scale = p[f"g{i}"] / jnp.sqrt(p[f"rv{i}"] + eps)
        shift = p[f"be{i}"] - p[f"rm{i}"] * scale
        w = (p[f"w{i}"] * scale[None, :]).astype(jnp.float32)
        b = (p[f"b{i}"] * scale + shift).astype(jnp.float32)
        return w, b.reshape(1, -1)

    w0, b0 = fold(0)
    w1, b1 = fold(1)
    w2, b2 = fold(2)
    wl = p["wl"].astype(jnp.float32)
    bl = p["bl"].reshape(1, -1).astype(jnp.float32)
    weights = (w0, b0, w1, b1, w2, b2, wl, bl)
    wbytes = sum(int(a.size) * 4 for a in weights)

    # --- budget-driven tile sizing ---
    tb = _pick_batch_tile(B)

    def per_buffer_budget(tb_):
        scratch = tb_ * C * 128 * 4           # lane-shaped accumulator
        out_buf = 2 * tb_ * C * 4             # double-buffered (tb,1,C) output
        return (_VMEM_BUDGET_BYTES - 2 * wbytes - scratch - out_buf) // 2

    while tb > 1 and tb * C * 128 * dtype_bytes > per_buffer_budget(tb):
        tb -= 1
        while B % tb:
            tb -= 1
    x_block_budget = min(max(per_buffer_budget(tb), tb * C * 128 * dtype_bytes),
                         _MAX_X_BLOCK_BYTES)
    thw, HW_pad = _pick_spatial_tile(HW, tb * C * dtype_bytes, x_block_budget)

    x3 = x.reshape(B, C, HW)
    if HW_pad != HW:
        # TODO(synk): mask the last HW tile in-kernel to avoid this pad copy.
        x3 = jnp.pad(x3, ((0, 0), (0, 0), (0, HW_pad - HW)))

    grid = (B // tb, HW_pad // thw)
    lane_groups = thw // 128

    est_vmem = (2 * tb * C * thw * dtype_bytes + 2 * wbytes
                + tb * C * 128 * 4 + 2 * tb * C * 4)
    vmem_limit = int(min(64 * 1024 * 1024,
                         max(32 * 1024 * 1024, est_vmem + 8 * 1024 * 1024)))

    def const_spec(a):
        return pl.BlockSpec(a.shape, lambda b, k: (0, 0))

    attn = pl.pallas_call(
        functools.partial(bam_ca_kernel, inv_hw=1.0 / HW, lane_groups=lane_groups),
        out_shape=jax.ShapeDtypeStruct((B, 1, C), jnp.float32),
        grid=grid,
        in_specs=[
            # x: lane-dense (tb, C, thw) tiles, reduction over the last grid axis
            pl.BlockSpec((tb, C, thw), lambda b, k: (b, 0, k)),
            const_spec(w0), const_spec(b0),
            const_spec(w1), const_spec(b1),
            const_spec(w2), const_spec(b2),
            const_spec(wl), const_spec(bl),
        ],
        # Output resident across the reduction axis (same block index for all k).
        out_specs=pl.BlockSpec((tb, 1, C), lambda b, k: (b, 0, 0)),
        scratch_shapes=[pltpu.VMEM((tb, C, 128), jnp.float32)],
        compiler_params=pltpu.CompilerParams(
            dimension_semantics=("parallel", "arbitrary"),
            vmem_limit_bytes=vmem_limit),
    )(x3, w0, b0, w1, b1, w2, b2, wl, bl)

    attn = attn.reshape(B, C)
    if not expand_output:
        return attn
    # unsqueeze(-1).unsqueeze(-1).expand_as(x): done in plain XLA so it can fuse
    # into whatever consumes the attention map (no extra HBM write from the kernel).
    return jnp.broadcast_to(attn[:, :, None, None], (B, C, H, W)).astype(x.dtype)


def init_params(key, channel, reduction=16):
    """Deterministic synthetic parameters matching BAM_ChannelAttention shapes.

    Linear weights are stored as (in_features, out_features) so the kernel
    computes y = x @ W + b (equivalent to PyTorch's x @ W^T + b).
    """
    ch = channel // reduction
    dims = [channel, ch, ch, ch, channel]
    keys = jax.random.split(key, 32)
    p = {}
    k = 0
    for i in range(3):
        fan_in, fan_out = dims[i], dims[i + 1]
        p[f"w{i}"] = (jax.random.normal(keys[k], (fan_in, fan_out), jnp.float32)
                      * (1.0 / jnp.sqrt(fan_in))); k += 1
        p[f"b{i}"] = 0.01 * jax.random.normal(keys[k], (fan_out,), jnp.float32); k += 1
        p[f"g{i}"] = 0.5 + jax.random.uniform(keys[k], (fan_out,), jnp.float32); k += 1
        p[f"be{i}"] = 0.1 * jax.random.normal(keys[k], (fan_out,), jnp.float32); k += 1
        p[f"rm{i}"] = 0.1 * jax.random.normal(keys[k], (fan_out,), jnp.float32); k += 1
        p[f"rv{i}"] = 0.5 + jax.random.uniform(keys[k], (fan_out,), jnp.float32); k += 1
    fan_in, fan_out = dims[-2], dims[-1]
    p["wl"] = (jax.random.normal(keys[k], (fan_in, fan_out), jnp.float32)
               * (1.0 / jnp.sqrt(fan_in))); k += 1
    p["bl"] = 0.01 * jax.random.normal(keys[k], (fan_out,), jnp.float32); k += 1
    return p


def reference(x, p, eps=1e-5):
    """Pure-JAX reference mirroring the PyTorch forward (eval-mode BN)."""
    pooled = x.mean(axis=(2, 3))                     # (B, C)
    h = pooled
    for i in range(3):
        h = h @ p[f"w{i}"] + p[f"b{i}"]
        h = (h - p[f"rm{i}"]) / jnp.sqrt(p[f"rv{i}"] + eps) * p[f"g{i}"] + p[f"be{i}"]
        h = jnp.maximum(h, 0.0)
    y = h @ p["wl"] + p["bl"]                        # (B, C)
    return jnp.broadcast_to(y[:, :, None, None], x.shape)


if __name__ == "__main__":
    key = jax.random.PRNGKey(0)
    # channel=64, reduction=16 -> hidden=4; HW=1024 -> tb=1 (2 parallel programs),
    # thw=1024 (single reduction step), lane_groups=8.
    B, C, H, W = 2, 64, 32, 32
    kx, kp = jax.random.split(key)
    x = jax.random.normal(kx, (B, C, H, W), dtype=jnp.float32)
    params = init_params(kp, C, reduction=16)

    out = bam_channel_attention(x, params)
    out = jax.block_until_ready(out)

    ref = reference(x, params)
    assert out.shape == x.shape, (out.shape, x.shape)
    err = float(jnp.max(jnp.abs(out - ref)))
    assert jnp.allclose(out, ref, atol=1e-4, rtol=1e-4), err
    print("KERNEL_OK")
</pallas_src>

<mosaic_0001>
module attributes {stable_mosaic.version = 11 : i64} {
  func.func @bam_ca_kernel(%arg0: i32, %arg1: i32, %arg2: memref<1x64x1024xf32, #tpu.memory_space<vmem>>, %arg3: memref<64x4xf32, #tpu.memory_space<vmem>>, %arg4: memref<1x4xf32, #tpu.memory_space<vmem>>, %arg5: memref<4x4xf32, #tpu.memory_space<vmem>>, %arg6: memref<1x4xf32, #tpu.memory_space<vmem>>, %arg7: memref<4x4xf32, #tpu.memory_space<vmem>>, %arg8: memref<1x4xf32, #tpu.memory_space<vmem>>, %arg9: memref<4x64xf32, #tpu.memory_space<vmem>>, %arg10: memref<1x64xf32, #tpu.memory_space<vmem>>, %arg11: memref<1x1x64xf32, #tpu.memory_space<vmem>>, %arg12: memref<1x64x128xf32, #tpu.memory_space<vmem>>) attributes {dimension_semantics = [#tpu.dimension_semantics<parallel>, #tpu.dimension_semantics<arbitrary>], iteration_bounds = array<i64: 2, 1>, scalar_prefetch = 0 : i64, scratch_operands = 1 : i64, tpu.core_type = #tpu.core_type<tc>, window_params = [{transform_indices = @transform_0, window_bounds = array<i64: 1, 64, 1024>}, {pipeline_mode = #tpu.pipeline_mode<synchronous>, transform_indices = @transform_1, window_bounds = array<i64: 64, 4>}, {pipeline_mode = #tpu.pipeline_mode<synchronous>, transform_indices = @transform_2, window_bounds = array<i64: 1, 4>}, {pipeline_mode = #tpu.pipeline_mode<synchronous>, transform_indices = @transform_3, window_bounds = array<i64: 4, 4>}, {pipeline_mode = #tpu.pipeline_mode<synchronous>, transform_indices = @transform_4, window_bounds = array<i64: 1, 4>}, {pipeline_mode = #tpu.pipeline_mode<synchronous>, transform_indices = @transform_5, window_bounds = array<i64: 4, 4>}, {pipeline_mode = #tpu.pipeline_mode<synchronous>, transform_indices = @transform_6, window_bounds = array<i64: 1, 4>}, {pipeline_mode = #tpu.pipeline_mode<synchronous>, transform_indices = @transform_7, window_bounds = array<i64: 4, 64>}, {pipeline_mode = #tpu.pipeline_mode<synchronous>, transform_indices = @transform_8, window_bounds = array<i64: 1, 64>}, {transform_indices = @transform_9, window_bounds = array<i64: 1, 1, 64>}]} {
    %c0_i32 = arith.constant 0 : i32
    %0 = arith.cmpi eq, %arg1, %c0_i32 : i32
    %1 = arith.extui %0 : i1 to i32
    %c0_i32_0 = arith.constant 0 : i32
    %2 = arith.cmpi ne, %1, %c0_i32_0 : i32
    scf.if %2 {
      %cst = arith.constant 0.000000e+00 : f32
      %24 = vector.broadcast %cst : f32 to vector<1x64x128xf32>
      %c0_25 = arith.constant 0 : index
      %c0_26 = arith.constant 0 : index
      %c0_27 = arith.constant 0 : index
      %25 = vector.load %arg12[%c0_25, %c0_26, %c0_27] : memref<1x64x128xf32, #tpu.memory_space<vmem>>, vector<1x64x128xf32>
      tpu.vector_store %arg12[%c0_25, %c0_26, %c0_27], %24 {strides = array<i32>} : memref<1x64x128xf32, #tpu.memory_space<vmem>>, vector<1x64x128xf32>,
    } else {
    }
    %c0 = arith.constant 0 : index
    %c0_1 = arith.constant 0 : index
    %c0_2 = arith.constant 0 : index
    %3 = vector.load %arg2[%c0, %c0_1, %c0_2] : memref<1x64x1024xf32, #tpu.memory_space<vmem>>, vector<1x64x128xf32>
    %c0_3 = arith.constant 0 : index
    %c0_4 = arith.constant 0 : index
    %c128 = arith.constant 128 : index
    %4 = vector.load %arg2[%c0_3, %c0_4, %c128] : memref<1x64x1024xf32, #tpu.memory_space<vmem>>, vector<1x64x128xf32>
    %5 = arith.addf %3, %4 : vector<1x64x128xf32>
    %c0_5 = arith.constant 0 : index
    %c0_6 = arith.constant 0 : index
    %c256 = arith.constant 256 : index
    %6 = vector.load %arg2[%c0_5, %c0_6, %c256] : memref<1x64x1024xf32, #tpu.memory_space<vmem>>, vector<1x64x128xf32>
    %7 = arith.addf %5, %6 : vector<1x64x128xf32>
    %c0_7 = arith.constant 0 : index
    %c0_8 = arith.constant 0 : index
    %c384 = arith.constant 384 : index
    %8 = vector.load %arg2[%c0_7, %c0_8, %c384] : memref<1x64x1024xf32, #tpu.memory_space<vmem>>, vector<1x64x128xf32>
    %9 = arith.addf %7, %8 : vector<1x64x128xf32>
    %c0_9 = arith.constant 0 : index
    %c0_10 = arith.constant 0 : index
    %c512 = arith.constant 512 : index
    %10 = vector.load %arg2[%c0_9, %c0_10, %c512] : memref<1x64x1024xf32, #tpu.memory_space<vmem>>, vector<1x64x128xf32>
    %11 = arith.addf %9, %10 : vector<1x64x128xf32>
    %c0_11 = arith.constant 0 : index
    %c0_12 = arith.constant 0 : index
    %c640 = arith.constant 640 : index
    %12 = vector.load %arg2[%c0_11, %c0_12, %c640] : memref<1x64x1024xf32, #tpu.memory_space<vmem>>, vector<1x64x128xf32>
    %13 = arith.addf %11, %12 : vector<1x64x128xf32>
    %c0_13 = arith.constant 0 : index
    %c0_14 = arith.constant 0 : index
    %c768 = arith.constant 768 : index
    %14 = vector.load %arg2[%c0_13, %c0_14, %c768] : memref<1x64x1024xf32, #tpu.memory_space<vmem>>, vector<1x64x128xf32>
    %15 = arith.addf %13, %14 : vector<1x64x128xf32>
    %c0_15 = arith.constant 0 : index
    %c0_16 = arith.constant 0 : index
    %c896 = arith.constant 896 : index
    %16 = vector.load %arg2[%c0_15, %c0_16, %c896] : memref<1x64x1024xf32, #tpu.memory_space<vmem>>, vector<1x64x128xf32>
    %17 = arith.addf %15, %16 : vector<1x64x128xf32>
    %c0_17 = arith.constant 0 : index
    %c0_18 = arith.constant 0 : index
    %c0_19 = arith.constant 0 : index
    %18 = vector.load %arg12[%c0_17, %c0_18, %c0_19] : memref<1x64x128xf32, #tpu.memory_space<vmem>>, vector<1x64x128xf32>
    %19 = arith.addf %18, %17 : vector<1x64x128xf32>
    %c0_20 = arith.constant 0 : index
    %c0_21 = arith.constant 0 : index
    %c0_22 = arith.constant 0 : index
    %20 = vector.load %arg12[%c0_20, %c0_21, %c0_22] : memref<1x64x128xf32, #tpu.memory_space<vmem>>, vector<1x64x128xf32>
    tpu.vector_store %arg12[%c0_20, %c0_21, %c0_22], %19 {strides = array<i32>} : memref<1x64x128xf32, #tpu.memory_space<vmem>>, vector<1x64x128xf32>,
    %c0_i32_23 = arith.constant 0 : i32
    %21 = arith.cmpi eq, %arg1, %c0_i32_23 : i32
    %22 = arith.extui %21 : i1 to i32
    %c0_i32_24 = arith.constant 0 : i32
    %23 = arith.cmpi ne, %22, %c0_i32_24 : i32
    scf.if %23 {
      %c0_25 = arith.constant 0 : index
      %c0_26 = arith.constant 0 : index
      %c0_27 = arith.constant 0 : index
      %24 = vector.load %arg12[%c0_25, %c0_26, %c0_27] : memref<1x64x128xf32, #tpu.memory_space<vmem>>, vector<1x64x128xf32>
      %cst = arith.constant dense<0.000000e+00> : vector<1x64xf32>
      %25 = vector.multi_reduction <add>, %24, %cst [2] : vector<1x64x128xf32> to vector<1x64xf32>
      %cst_28 = arith.constant 9.765625E-4 : f32
      %26 = vector.broadcast %cst_28 : f32 to vector<1x64xf32>
      %27 = arith.mulf %25, %26 : vector<1x64xf32>
      %c0_29 = arith.constant 0 : index
      %c0_30 = arith.constant 0 : index
      %28 = vector.load %arg3[%c0_29, %c0_30] : memref<64x4xf32, #tpu.memory_space<vmem>>, vector<64x4xf32>
      %cst_31 = arith.constant dense<0.000000e+00> : vector<1x4xf32>
      %29 = tpu.matmul %27, %28, %cst_31 {dimension_numbers = #tpu.dot_dimension_numbers<[1], [0], [0], [1], [0, 0, 1, 1], [], []>} : vector<1x64xf32>, vector<64x4xf32>, vector<1x4xf32> -> vector<1x4xf32>
      %c0_32 = arith.constant 0 : index
      %c0_33 = arith.constant 0 : index
      %30 = vector.load %arg4[%c0_32, %c0_33] : memref<1x4xf32, #tpu.memory_space<vmem>>, vector<1x4xf32>
      %31 = arith.addf %29, %30 : vector<1x4xf32>
      %cst_34 = arith.constant 0.000000e+00 : f32
      %32 = vector.broadcast %cst_34 : f32 to vector<1x4xf32>
      %33 = arith.maximumf %31, %32 : vector<1x4xf32>
      %c0_35 = arith.constant 0 : index
      %c0_36 = arith.constant 0 : index
      %34 = vector.load %arg5[%c0_35, %c0_36] : memref<4x4xf32, #tpu.memory_space<vmem>>, vector<4x4xf32>
      %cst_37 = arith.constant dense<0.000000e+00> : vector<1x4xf32>
      %35 = tpu.matmul %33, %34, %cst_37 {dimension_numbers = #tpu.dot_dimension_numbers<[1], [0], [0], [1], [0, 0, 1, 1], [], []>} : vector<1x4xf32>, vector<4x4xf32>, vector<1x4xf32> -> vector<1x4xf32>
      %c0_38 = arith.constant 0 : index
      %c0_39 = arith.constant 0 : index
      %36 = vector.load %arg6[%c0_38, %c0_39] : memref<1x4xf32, #tpu.memory_space<vmem>>, vector<1x4xf32>
      %37 = arith.addf %35, %36 : vector<1x4xf32>
      %cst_40 = arith.constant 0.000000e+00 : f32
      %38 = vector.broadcast %cst_40 : f32 to vector<1x4xf32>
      %39 = arith.maximumf %37, %38 : vector<1x4xf32>
      %c0_41 = arith.constant 0 : index
      %c0_42 = arith.constant 0 : index
      %40 = vector.load %arg7[%c0_41, %c0_42] : memref<4x4xf32, #tpu.memory_space<vmem>>, vector<4x4xf32>
      %cst_43 = arith.constant dense<0.000000e+00> : vector<1x4xf32>
      %41 = tpu.matmul %39, %40, %cst_43 {dimension_numbers = #tpu.dot_dimension_numbers<[1], [0], [0], [1], [0, 0, 1, 1], [], []>} : vector<1x4xf32>, vector<4x4xf32>, vector<1x4xf32> -> vector<1x4xf32>
      %c0_44 = arith.constant 0 : index
      %c0_45 = arith.constant 0 : index
      %42 = vector.load %arg8[%c0_44, %c0_45] : memref<1x4xf32, #tpu.memory_space<vmem>>, vector<1x4xf32>
      %43 = arith.addf %41, %42 : vector<1x4xf32>
      %cst_46 = arith.constant 0.000000e+00 : f32
      %44 = vector.broadcast %cst_46 : f32 to vector<1x4xf32>
      %45 = arith.maximumf %43, %44 : vector<1x4xf32>
      %c0_47 = arith.constant 0 : index
      %c0_48 = arith.constant 0 : index
      %46 = vector.load %arg9[%c0_47, %c0_48] : memref<4x64xf32, #tpu.memory_space<vmem>>, vector<4x64xf32>
      %cst_49 = arith.constant dense<0.000000e+00> : vector<1x64xf32>
      %47 = tpu.matmul %45, %46, %cst_49 {dimension_numbers = #tpu.dot_dimension_numbers<[1], [0], [0], [1], [0, 0, 1, 1], [], []>} : vector<1x4xf32>, vector<4x64xf32>, vector<1x64xf32> -> vector<1x64xf32>
      %c0_50 = arith.constant 0 : index
      %c0_51 = arith.constant 0 : index
      %48 = vector.load %arg10[%c0_50, %c0_51] : memref<1x64xf32, #tpu.memory_space<vmem>>, vector<1x64xf32>
      %49 = arith.addf %47, %48 : vector<1x64xf32>
      %c0_52 = arith.constant 0 : index
      %c0_53 = arith.constant 0 : index
      %c0_54 = arith.constant 0 : index
      %50 = vector.load %arg11[%c0_52, %c0_53, %c0_54] : memref<1x1x64xf32, #tpu.memory_space<vmem>>, vector<1x1x64xf32>
      %51 = vector.shape_cast %50 : vector<1x1x64xf32> to vector<1x64xf32>
      %52 = vector.shape_cast %49 : vector<1x64xf32> to vector<1x1x64xf32>
      tpu.vector_store %arg11[%c0_52, %c0_53, %c0_54], %52 {strides = array<i32>} : memref<1x1x64xf32, #tpu.memory_space<vmem>>, vector<1x1x64xf32>,
    } else {
    }
    return
  }
  func.func @transform_0(%arg0: i32, %arg1: i32) -> (i32, i32, i32) {
    %c0_i32 = arith.constant 0 : i32
    %c0_i32_0 = arith.constant 0 : i32
    return %arg0, %c0_i32, %arg1 : i32, i32, i32
  }
  func.func @transform_1(%arg0: i32, %arg1: i32) -> (i32, i32) {
    %c0_i32 = arith.constant 0 : i32
    %c0_i32_0 = arith.constant 0 : i32
    %c0_i32_1 = arith.constant 0 : i32
    return %c0_i32, %c0_i32_0 : i32, i32
  }
  func.func @transform_2(%arg0: i32, %arg1: i32) -> (i32, i32) {
    %c0_i32 = arith.constant 0 : i32
    %c0_i32_0 = arith.constant 0 : i32
    %c0_i32_1 = arith.constant 0 : i32
    return %c0_i32, %c0_i32_0 : i32, i32
  }
  func.func @transform_3(%arg0: i32, %arg1: i32) -> (i32, i32) {
    %c0_i32 = arith.constant 0 : i32
    %c0_i32_0 = arith.constant 0 : i32
    %c0_i32_1 = arith.constant 0 : i32
    return %c0_i32, %c0_i32_0 : i32, i32
  }
  func.func @transform_4(%arg0: i32, %arg1: i32) -> (i32, i32) {
    %c0_i32 = arith.constant 0 : i32
    %c0_i32_0 = arith.constant 0 : i32
    %c0_i32_1 = arith.constant 0 : i32
    return %c0_i32, %c0_i32_0 : i32, i32
  }
  func.func @transform_5(%arg0: i32, %arg1: i32) -> (i32, i32) {
    %c0_i32 = arith.constant 0 : i32
    %c0_i32_0 = arith.constant 0 : i32
    %c0_i32_1 = arith.constant 0 : i32
    return %c0_i32, %c0_i32_0 : i32, i32
  }
  func.func @transform_6(%arg0: i32, %arg1: i32) -> (i32, i32) {
    %c0_i32 = arith.constant 0 : i32
    %c0_i32_0 = arith.constant 0 : i32
    %c0_i32_1 = arith.constant 0 : i32
    return %c0_i32, %c0_i32_0 : i32, i32
  }
  func.func @transform_7(%arg0: i32, %arg1: i32) -> (i32, i32) {
    %c0_i32 = arith.constant 0 : i32
    %c0_i32_0 = arith.constant 0 : i32
    %c0_i32_1 = arith.constant 0 : i32
    return %c0_i32, %c0_i32_0 : i32, i32
  }
  func.func @transform_8(%arg0: i32, %arg1: i32) -> (i32, i32) {
    %c0_i32 = arith.constant 0 : i32
    %c0_i32_0 = arith.constant 0 : i32
    %c0_i32_1 = arith.constant 0 : i32
    return %c0_i32, %c0_i32_0 : i32, i32
  }
  func.func @transform_9(%arg0: i32, %arg1: i32) -> (i32, i32, i32) {
    %c0_i32 = arith.constant 0 : i32
    %c0_i32_0 = arith.constant 0 : i32
    %c0_i32_1 = arith.constant 0 : i32
    return %arg0, %c0_i32, %c0_i32_0 : i32, i32, i32
  }
}

</mosaic_0001>

<bundles_post_ra>
// kernel: tpu_custom_call.1
= control target key start
LH: loop header
LB: loop body
LE: loop exit
PB: predicated region body
PF: predicated region fallthrough
CT: control target
= control target key end

     0   :  { %14 = vsyncpa [#allocation4], 0  ;;  %s1299_s0 = inlined_call_operand.hbm [shape: f32[2,64,1024], index: 0, kind: input, shape index: {}]   ;;  %s1300_s1 = inlined_call_operand.vmem [shape: f32[64,4], index: 1, kind: input, shape index: {}]   ;;  %s1301_s2 = inlined_call_operand.vmem [shape: f32[1,4], index: 2, kind: input, shape index: {}]   ;;  %s1302_s3 = inlined_call_operand.vmem [shape: f32[4,4], index: 3, kind: input, shape index: {}]   ;;  %s1303_s4 = inlined_call_operand.vmem [shape: f32[1,4], index: 4, kind: input, shape index: {}]   ;;  %s1304_s5 = inlined_call_operand.vmem [shape: f32[4,4], index: 5, kind: input, shape index: {}]   ;;  %s1305_s6 = inlined_call_operand.vmem [shape: f32[1,4], index: 6, kind: input, shape index: {}]   ;;  %s1306_s7 = inlined_call_operand.vmem [shape: f32[4,64], index: 7, kind: input, shape index: {}]   ;;  %s1307_s8 = inlined_call_operand.vmem [shape: f32[1,64], index: 8, kind: input, shape index: {}]   ;;  %s1308_s9 = inlined_call_operand.hbm [shape: f32[2,1,64], index: 9, kind: output, shape index: {}]  }
   0x1   :  { %16 = vsyncpa [#allocation4 + $0x1], 0 }
   0x2   :  { %17 = vsyncpa [#allocation5], 0 }
   0x3   :  { %19 = vsyncpa [#allocation5 + $0x1], 0  ;;  %s1061_s30 = smov 0   ;;  %s1063_s10 = smov 0  }
   0x4   :  { %s1065_s11 = smov 0   ;;  %s1067_s12 = smov 0  }
   0x5   :  { %s1069_s13 = smov 0   ;;  %s1071_s14 = smov 0  }
   0x6 LB: > { %1312 = sst [smem:[#allocation9_spill]] %s987_s30  ;;  %s812_s15 = sadd.s32 4294967295, %s1007_s14   ;;  %s1007_s14 = sphi %s1071_s14, %s25_s14   ;;  %s1003_s13 = sphi %s1069_s13, %s1323_s13   ;;  %s999_s12 = sphi %s1067_s12, %s1322_s12   ;;  %s995_s11 = sphi %s1065_s11, %s1326_s11   ;;  %s991_s10 = sphi %s1063_s10, %s1325_s10   ;;  %s987_s30 = sphi %s1061_s30, %s1324_s30  }
   0x7   : > { %1313 = sst [smem:[#allocation10_spill]] %s1003_s13  ;;  %s813_s16 = sadd.s32 4294967294, %s1007_s14  }
   0x8   : > { %s37_s17 = sadd.s32 1, %s1003_s13  ;;  %s46_s18 = sadd.s32 1, %s995_s11 }
   0x9   : > { %p39_p0 = scmp.ge.s32.totalorder %s37_s17, 2  ;;  %p53_p1 = scmp.ne.s32.totalorder %s995_s11, %s991_s10 }
   0xa   : > { %p54_p2 = scmp.eq.s32.totalorder %s1007_s14, 0  ;;  %p59_p3 = scmp.ne.s32.totalorder %s991_s10, %s987_s30 }
   0xb   : > { %s1328_s17 = smov (%p39_p0, %s37_s17), 0  ;;  %p60_p5 = scmp.eq.s32.totalorder %s812_s15, 0 }
   0xc   : > { %1314 = sst [smem:[#allocation11_spill]] %s1328_s17  ;;  %p1102_p4 = por %p54_p2, %p53_p1 }
   0xd   : > { %s41_s20 = ssub.s32 %s1003_s13, %s1328_s17  ;;  %p251_p6 = scmp.eq.s32.totalorder %s812_s15, 1 }
   0xe   : > { %p44_p7 = scmp.eq.s32.totalorder %s41_s20, 0  ;;  %p1108_p8 = por %p60_p5, %p59_p3 }
   0xf   : > { %p1112_p9 = por %p251_p6, %p53_p1  ;;  %p257_p10 = scmp.eq.s32.totalorder %s813_s16, 1 }
  0x10   : > { %s1117_s23 = scalar_select %p44_p7, %s995_s11, %s46_s18  }
  0x11   : > { %p1119_p11 = por %p257_p10, %p59_p3  ;;  %p815_p12 = scmp.ge.s32.totalorder %s1007_s14, 2 }
  0x12   : > { %1318 = sst [smem:[#allocation12_spill]] %s1117_s23  ;;  %p843_p13 = scmp.lt.s32.totalorder %s1007_s14, 2 }
  0x13   : > { %s301_s25 = sand.u32 1, %s995_s11   ;;  %s830_s27 = sshll.u32 %s1003_s13, 9 }
  0x14   : > { %s816_s26 = sshll.u32 %s301_s25, 9  ;;  %s312_s15 = scalar_lea.hbm %s1299_s0, %s830_s27 }
  0x15   : > { %s305_s20 = scalar_lea.vmem [#allocation3], %s816_s26  ;;  %s313_s30 = sshll.u32 %s312_s15, 4  ;;  %s314_s30 = int_to_ptr.hbm [resolvable:$true] %s313_s30 }
  0x16   : > { %s315_s17 = sshll.u32 %s305_s20, 4  ;;  %p836_p0 = pnand %p843_p13, %p1102_p4  ;;  %s316_s17 = int_to_ptr.vmem [resolvable:$true] %s315_s17 }
  0x17   : > { %p819_p1 = scmp.ge.s32.totalorder %s1007_s14, 1  ;;  %s302_s16 = scalar_lea.sflag [#allocation4], %s301_s25 }
  0x18   : > { %s1009_s18 = smov 1024   ;;  %s1010_s23 = smov 64  }
  0x19   : > { %838 = dma.hbm_to_vmem [thread:$0]  (!%p836_p0), %s314_s30, 8192, %s316_s17, %s302_s16, %s1009_s18, %s1009_s18, %s1010_s23  }
  0x1a   : > { %p323_p2 = scmp.lt.s32.totalorder %s1007_s14, 3 }
  0x1c   : > { %p324_p3 = pnand %p819_p1, %p323_p2 }
  0x1d   : > { %s1135_s13 = sand.u32 (!%p324_p3), 1, %s991_s10  }
  0x1e   : > { %327 = sbr.rel (%p324_p3) target bundleno = 723 (0x2d3), region = 56  ;;  %s820_s26 = sshll.u32 (!%p324_p3), %s1135_s13, 9 }
  0x1f   : > { %s330_s27 = scalar_lea.sflag (!%p324_p3), [#allocation4], %s1135_s13  ;;  %s1139_s28 = scalar_lea.vmem (!%p324_p3), [#allocation3], %s820_s26 }
  0x23   : > { %978 = dma.done.wait (%p1108_p8), %s330_s27, 8192  }
  0x24   : > { %980 = vsyncadd (%p1108_p8), %s330_s27, 4294959104  ;;  %v381_v0 = vld [vmem:[%s1139_s28] sm:$0xff]  ;;  %v389_v1 = vld [vmem:[%s1139_s28 + $0x8] sm:$0xff]  ;;  %vm582_vm0 = vcmask 130112   ;;  %vm586_vm1 = vcmask 195712   ;;  %vm590_vm2 = vcmask 261312   ;;  %s731_s19 = scalar_lea.hbm %s1308_s9, %s999_s12 }
  0x25   : > { %v405_v2 = vld [vmem:[%s1139_s28 + $0x10] sm:$0xff]  ;;  %v397_v3 = vadd.f32 %v389_v1, %v381_v0  ;;  %v421_v4 = vld [vmem:[%s1139_s28 + $0x18] sm:$0xff]  ;;  %v383_v5 = vld [vmem:[%s1139_s28 + $0x80] sm:$0xff]  ;;  %vm594_vm3 = vcmask 326912   ;;  %vm598_vm4 = vcmask 392512   ;;  %vm602_vm5 = vcmask 458112  }
  0x26   : > { %v391_v7 = vld [vmem:[%s1139_s28 + $0x88] sm:$0xff]  ;;  %v407_v8 = vld [vmem:[%s1139_s28 + $0x90] sm:$0xff]  ;;  %v437_v9 = vld [vmem:[%s1139_s28 + $0x20] sm:$0xff]  ;;  %vm606_vm6 = vcmask 523712   ;;  %vm608_vm7 = vcmask 523264   ;;  %vm638_vm8 = vcmask 1043456  }
  0x27   : > { %v413_v6 = vadd.f32 %v405_v2, %v397_v3  ;;  %v399_v10 = vadd.f32 %v391_v7, %v383_v5  ;;  %v423_v12 = vld [vmem:[%s1139_s28 + $0x98] sm:$0xff]  ;;  %v385_v13 = vld [vmem:[%s1139_s28 + $0x100] sm:$0xff]  ;;  %v393_v14 = vld [vmem:[%s1139_s28 + $0x108] sm:$0xff]  ;;  %vm634_vm9 = vcmask 31744   ;;  %s367_s25 = scalar_lea.vmem [#allocation6], %s1135_s13  ;;  %s735_s15 = sshll.u32 %s731_s19, 4  ;;  %s736_s15 = int_to_ptr.hbm [resolvable:$true] %s735_s15 }
  0x28   : > { %v453_v15 = vld [vmem:[%s1139_s28 + $0x28] sm:$0xff]  ;;  %v401_v17 = vadd.f32 %v393_v14, %v385_v13  ;;  %v409_v18 = vld [vmem:[%s1139_s28 + $0x110] sm:$0xff]  ;;  %v439_v21 = vld [vmem:[%s1139_s28 + $0xa0] sm:$0xff]  ;;  %s733_s29 = sshll.u32 %s367_s25, 4  ;;  %vm720_vm10 = vcmask 516096   ;;  %s723_s20 = scalar_lea.sflag [#allocation5], %s1135_s13  ;;  %s734_s29 = int_to_ptr.vmem [resolvable:$true] %s733_s29 }
  0x29   : > { %v429_v11 = vadd.f32 %v421_v4, %v413_v6  ;;  %v415_v16 = vadd.f32 %v407_v8, %v399_v10  ;;  %v469_v20 = vld [vmem:[%s1139_s28 + $0x30] sm:$0xff]  ;;  %v425_v22 = vld [vmem:[%s1139_s28 + $0x118] sm:$0xff]  ;;  %v382_v25 = vld [vmem:[%s1139_s28 + $0x40] sm:$0xff]  ;;  %s939_s16 = sshra.s32 %s736_s15, 4  ;;  %s945_s27 = scalar_lea.hbm %s1308_s9, 2  ;;  %s940_s16 = int_to_ptr.hbm [resolvable:$true] %s939_s16 }
  0x2a   : > { %v417_v24 = vadd.f32 %v409_v18, %v401_v17  ;;  %v390_v26 = vld [vmem:[%s1139_s28 + $0x48] sm:$0xff]  ;;  %v406_v27 = vld [vmem:[%s1139_s28 + $0x50] sm:$0xff]  ;;  %v485_v29 = vld [vmem:[%s1139_s28 + $0x38] sm:$0xff]  ;;  %s941_s18 = scalar_lea.hbm %s940_s16, 1  ;;  %p946_p7 = scmp.lt.s32.totalorder %s940_s16, %s1308_s9 }
  0x2b   : > { %v445_v19 = vadd.f32 %v437_v9, %v429_v11  ;;  %v431_v23 = vadd.f32 %v423_v12, %v415_v16  ;;  %v455_v30 = vld [vmem:[%s1139_s28 + $0xa8] sm:$0xff]  ;;  %v441_v31 = vld [vmem:[%s1139_s28 + $0x120] sm:$0xff]  ;;  %v398_v32 = vadd.f32 %v390_v26, %v382_v25  ;;  %v471_v34 = vld [vmem:[%s1139_s28 + $0xb0] sm:$0xff]  ;;  %p942_p4 = scmp.ne.s32.totalorder %s940_s16, %s941_s18  ;;  %p947_p8 = scmp.lt.s32.totalorder %s945_s27, %s941_s18 }
  0x2c   : > { %v433_v35 = vadd.f32 %v425_v22, %v417_v24  ;;  %v422_v36 = vld [vmem:[%s1139_s28 + $0x58] sm:$0xff]  ;;  %v384_v37 = vld [vmem:[%s1139_s28 + $0xc0] sm:$0xff]  ;;  %v457_v39 = vld [vmem:[%s1139_s28 + $0x128] sm:$0xff] }
  0x2d   : > { %v461_v28 = vadd.f32 %v453_v15, %v445_v19  ;;  %v447_v33 = vadd.f32 %v439_v21, %v431_v23  ;;  %v414_v40 = vadd.f32 %v406_v27, %v398_v32  ;;  %v392_v41 = vld [vmem:[%s1139_s28 + $0xc8] sm:$0xff]  ;;  %v408_v42 = vld [vmem:[%s1139_s28 + $0xd0] sm:$0xff]  ;;  %v487_v44 = vld [vmem:[%s1139_s28 + $0xb8] sm:$0xff]  ;;  %p943_p5 = pnand %p942_p4, %p1112_p9  ;;  %p948_p10 = por %p947_p8, %p946_p7 }
  0x2e   : > { %v449_v45 = vadd.f32 %v441_v31, %v433_v35  ;;  %v473_v46 = vld [vmem:[%s1139_s28 + $0x130] sm:$0xff]  ;;  %v438_v47 = vld [vmem:[%s1139_s28 + $0x60] sm:$0xff]  ;;  %v400_v48 = vadd.f32 %v392_v41, %v384_v37  ;;  %v424_v51 = vld [vmem:[%s1139_s28 + $0xd8] sm:$0xff] }
  0x2f   : > { %v477_v38 = vadd.f32 %v469_v20, %v461_v28  ;;  %v463_v43 = vadd.f32 %v455_v30, %v447_v33  ;;  %v430_v50 = vadd.f32 %v422_v36, %v414_v40  ;;  %v386_v52 = vld [vmem:[%s1139_s28 + $0x140] sm:$0xff]  ;;  %v394_v53 = vld [vmem:[%s1139_s28 + $0x148] sm:$0xff]  ;;  %v489_v56 = vld [vmem:[%s1139_s28 + $0x138] sm:$0xff]  ;;  %p944_p6 = pneg %p943_p5 }
  0x30   : > { %v465_v55 = vadd.f32 %v457_v39, %v449_v45  ;;  %v454_v57 = vld [vmem:[%s1139_s28 + $0x68] sm:$0xff]  ;;  %v416_v58 = vadd.f32 %v408_v42, %v400_v48  ;;  %v402_v59 = vadd.f32 %v394_v53, %v386_v52  ;;  %v410_v60 = vld [vmem:[%s1139_s28 + $0x150] sm:$0xff]  ;;  %v440_v63 = vld [vmem:[%s1139_s28 + $0xe0] sm:$0xff] }
  0x31   : > { %v493_v49 = vadd.f32 %v485_v29, %v477_v38  ;;  %v479_v54 = vadd.f32 %v471_v34, %v463_v43  ;;  %v446_v61 = vadd.f32 %v438_v47, %v430_v50  ;;  %v470_v62 = vld [vmem:[%s1139_s28 + $0x70] sm:$0xff]  ;;  %v426_v0 = vld [vmem:[%s1139_s28 + $0x158] sm:$0xff]  ;;  %v387_v5 = vld [vmem:[%s1139_s28 + $0x180] sm:$0xff]  ;;  %p949_p13 = pnand %p948_p10, %p944_p6 }
  0x32   : > { %v481_v2 = vadd.f32 %v473_v46, %v465_v55  ;;  %v432_v3 = vadd.f32 %v424_v51, %v416_v58  ;;  %v418_v4 = vadd.f32 %v410_v60, %v402_v59  ;;  %v395_v6 = vld [vmem:[%s1139_s28 + $0x188] sm:$0xff]  ;;  %v411_v7 = vld [vmem:[%s1139_s28 + $0x190] sm:$0xff]  ;;  %v486_v9 = vld [vmem:[%s1139_s28 + $0x78] sm:$0xff] }
  0x33   : > { %536 = vadd.xlane.f32.xlu0 %v493_v49  ;;  %v495_v1 = vadd.f32 %v487_v44, %v479_v54  ;;  %v462_v8 = vadd.f32 %v454_v57, %v446_v61  ;;  %v456_v10 = vld [vmem:[%s1139_s28 + $0xe8] sm:$0xff]  ;;  %v442_v11 = vld [vmem:[%s1139_s28 + $0x160] sm:$0xff]  ;;  %v403_v12 = vadd.f32 %v395_v6, %v387_v5  ;;  %v472_v15 = vld [vmem:[%s1139_s28 + $0xf0] sm:$0xff] }
  0x34   : > { %v497_v13 = vadd.f32 %v489_v56, %v481_v2  ;;  %v448_v14 = vadd.f32 %v440_v63, %v432_v3  ;;  %v434_v16 = vadd.f32 %v426_v0, %v418_v4  ;;  %v427_v17 = vld [vmem:[%s1139_s28 + $0x198] sm:$0xff]  ;;  %v388_v18 = vld [vmem:[%s1139_s28 + $0x1c0] sm:$0xff]  ;;  %v458_v20 = vld [vmem:[%s1139_s28 + $0x168] sm:$0xff]  ;;  %v577_v0 = vlaneseq }
  0x35   : > { %540 = vadd.xlane.f32.xlu1 %v495_v1  ;;  %v478_v19 = vadd.f32 %v470_v62, %v462_v8  ;;  %v419_v21 = vadd.f32 %v411_v7, %v403_v12  ;;  %v396_v22 = vld [vmem:[%s1139_s28 + $0x1c8] sm:$0xff]  ;;  %v412_v23 = vld [vmem:[%s1139_s28 + $0x1d0] sm:$0xff]  ;;  %v443_v26 = vld [vmem:[%s1139_s28 + $0x1a0] sm:$0xff] }
  0x36   : > { %544 = vadd.xlane.f32.xlu2 %v497_v13  ;;  %v464_v24 = vadd.f32 %v456_v10, %v448_v14  ;;  %v450_v25 = vadd.f32 %v442_v11, %v434_v16  ;;  %v404_v27 = vadd.f32 %v396_v22, %v388_v18  ;;  %v488_v29 = vld [vmem:[%s1139_s28 + $0xf8] sm:$0xff]  ;;  %v474_v30 = vld [vmem:[%s1139_s28 + $0x170] sm:$0xff]  ;;  %v459_v35 = vld [vmem:[%s1139_s28 + $0x1a8] sm:$0xff]  ;;  %v578_v3 = vand.u32 127, %v577_v0 }
  0x37   : > { %v494_v28 = vadd.f32 %v486_v9, %v478_v19  ;;  %v435_v31 = vadd.f32 %v427_v17, %v419_v21  ;;  %v428_v32 = vld [vmem:[%s1139_s28 + $0x1d8] sm:$0xff]  ;;  %v444_v39 = vld [vmem:[%s1139_s28 + $0x1e0] sm:$0xff]  ;;  %v475_v42 = vld [vmem:[%s1139_s28 + $0x1b0] sm:$0xff] }
  0x38   : > { %v480_v33 = vadd.f32 %v472_v15, %v464_v24  ;;  %v466_v34 = vadd.f32 %v458_v20, %v450_v25  ;;  %v420_v36 = vadd.f32 %v412_v23, %v404_v27  ;;  %v490_v37 = vld [vmem:[%s1139_s28 + $0x178] sm:$0xff]  ;;  %v460_v45 = vld [vmem:[%s1139_s28 + $0x1e8] sm:$0xff]  ;;  %v476_v50 = vld [vmem:[%s1139_s28 + $0x1f0] sm:$0xff]  ;;  %v580_v6 = vadd.s32 4294967288, %v578_v3 }
  0x39   : > { %v451_v38 = vadd.f32 %v443_v26, %v435_v31  ;;  %v491_v47 = vld [vmem:[%s1139_s28 + $0x1b8] sm:$0xff]  ;;  %v566_v57 = vld [vmem:[%s1300_s1 + $0x30] sm:$0xff]  ;;  %v565_v58 = vld [vmem:[%s1300_s1 + $0x28] sm:$0xff]  ;;  %v584_v7 = vadd.s32 4294967280, %v578_v3  ;;  %v592_v11 = vadd.s32 4294967264, %v578_v3  ;;  %v588_v12 = vadd.s32 4294967272, %v578_v3 }
  0x3a   : > { %v496_v40 = vadd.f32 %v488_v29, %v480_v33  ;;  %v482_v41 = vadd.f32 %v474_v30, %v466_v34  ;;  %v436_v43 = vadd.f32 %v428_v32, %v420_v36  ;;  %v492_v53 = vld [vmem:[%s1139_s28 + $0x1f8] sm:$0xff]  ;;  %v564_v59 = vld [vmem:[%s1300_s1 + $0x20] sm:$0xff]  ;;  %v562_v61 = vld [vmem:[%s1300_s1 + $0x10] sm:$0xff]  ;;  %v596_v19 = vadd.s32 4294967256, %v578_v3 }
  0x3b   : > { %538 = vadd.xlane.f32.xlu0 %v494_v28  ;;  %v467_v44 = vadd.f32 %v459_v35, %v451_v38  ;;  %v567_v56 = vld [vmem:[%s1300_s1 + $0x38] sm:$0xff]  ;;  %v561_v62 = vld [vmem:[%s1300_s1 + $0x8] sm:$0xff]  ;;  %v560_v63 = vld [vmem:[%s1300_s1] sm:$0xff]  ;;  %v600_v26 = vadd.s32 4294967248, %v578_v3  ;;  %v604_v32 = vadd.s32 4294967240, %v578_v3 }
  0x3c   : > { %v498_v46 = vadd.f32 %v490_v37, %v482_v41  ;;  %v452_v48 = vadd.f32 %v444_v39, %v436_v43  ;;  %619 = vmatpush.msra.mxu0 %v567_v56  ;;  %v563_v60 = vld [vmem:[%s1300_s1 + $0x18] sm:$0xff]  ;;  %v568_v41 = vld [vmem:[%s1301_s2] sm:$0x1] }
  0x3d   : > { %542 = vadd.xlane.f32.xlu1 %v496_v40  ;;  %v483_v49 = vadd.f32 %v475_v42, %v467_v44  ;;  %v632_v40 = vld [vmem:[%s1302_s3] sm:$0xf] }
  0x3e   : > { %546 = vadd.xlane.f32.xlu2 %v498_v46  ;;  %v468_v51 = vadd.f32 %v460_v45, %v452_v48  ;;  %620 = vmatpush.msra.mxu0 %v566_v57  ;;  %v663_v45 = vld [vmem:[%s1304_s5] sm:$0xf] }
  0x3f   : > { %v499_v52 = vadd.f32 %v491_v47, %v483_v49  ;;  %822 = vmatpush.msk.msra.mxu1 %vm638_vm8, %v632_v40  ;;  %824 = vmatpush.msk.msra.mxu2 %vm638_vm8, %v663_v45  ;;  %v633_v46 = vld [vmem:[%s1303_s4] sm:$0x1] }
  0x40   : > { %v484_v54 = vadd.f32 %v476_v50, %v468_v51  ;;  %621 = vmatpush.msra.mxu0 %v565_v58  ;;  %v692_v50 = vld [vmem:[%s1306_s7] sm:$0xf] }
  0x41   : > { %826 = vmatpush.msk.msra.mxu3 %vm638_vm8, %v692_v50  ;;  %v664_v51 = vld [vmem:[%s1305_s6] sm:$0x1] }
  0x42   : > { %v500_v55 = vadd.f32 %v492_v53, %v484_v54  ;;  %622 = vmatpush.msra.mxu0 %v564_v59 }
  0x43   : > { %548 = vadd.xlane.f32.xlu0 %v499_v52 }
  0x44   : > { %623 = vmatpush.msra.mxu0 %v563_v60 }
  0x45   : > { %550 = vadd.xlane.f32.xlu1 %v500_v55  ;;  %v693_v55 = vld [vmem:[%s1307_s8] sm:$0x1] }
  0x46   : > { %624 = vmatpush.msra.mxu0 %v562_v61 }
  0x48   : > { %625 = vmatpush.msra.mxu0 %v561_v62 }
  0x4a   : > { %626 = vmatpush.msra.mxu0 %v560_v63 }
  0xa6   : > { %v537_v1 = vpop.xlane.xlu0 %536 }
  0xa7   : > { %v552_v5 = vmul.f32 0.0009765625, %v537_v1 }
  0xa8   : > { %v541_v2 = vpop.xlane.xlu1 %540 }
  0xa9   : > { %v545_v4 = vpop.xlane.xlu2 %544  ;;  %v554_v8 = vmul.f32 0.0009765625, %v541_v2  ;;  %v579_v13 = vperm.slane %v552_v5, %v578_v3 }
  0xaa   : > { %v556_v14 = vmul.f32 0.0009765625, %v545_v4 }
  0xab   : > { %v585_v17 = vperm.slane %v554_v8, %v584_v7 }
  0xac   : > { %v593_v25 = vperm.slane %v556_v14, %v592_v11 }
  0xae   : > { %v539_v9 = vpop.xlane.xlu0 %538 }
  0xaf   : > { %v553_v10 = vmul.f32 0.0009765625, %v539_v9 }
  0xb0   : > { %v543_v16 = vpop.xlane.xlu1 %542 }
  0xb1   : > { %v581_v15 = vperm.slane %v553_v10, %v580_v6  ;;  %v555_v18 = vmul.f32 0.0009765625, %v543_v16  ;;  %v547_v21 = vpop.xlane.xlu2 %546 }
  0xb2   : > { %v557_v24 = vmul.f32 0.0009765625, %v547_v21 }
  0xb3   : > { %v583_v20 = vsel %vm582_vm0, %v581_v15, %v579_v13  ;;  %v589_v23 = vperm.slane %v555_v18, %v588_v12 }
  0xb4   : > { %v587_v22 = vsel %vm586_vm1, %v585_v17, %v583_v20  ;;  %v597_v28 = vperm.slane %v557_v24, %v596_v19 }
  0xb5   : > { %v591_v27 = vsel %vm590_vm2, %v589_v23, %v587_v22 }
  0xb6   : > { %v549_v29 = vpop.xlane.xlu0 %548  ;;  %v595_v31 = vsel %vm594_vm3, %v593_v25, %v591_v27 }
  0xb7   : > { %v558_v30 = vmul.f32 0.0009765625, %v549_v29  ;;  %v599_v36 = vsel %vm598_vm4, %v597_v28, %v595_v31 }
  0xb8   : > { %v551_v34 = vpop.xlane.xlu1 %550 }
  0xb9   : > { %v601_v33 = vperm.slane %v558_v30, %v600_v26  ;;  %v559_v35 = vmul.f32 0.0009765625, %v551_v34 }
  0xbb   : > { %v603_v37 = vsel %vm602_vm5, %v601_v33, %v599_v36  ;;  %v605_v38 = vperm.slane %v559_v35, %v604_v32 }
  0xbd   : > { %v607_v39 = vsel %vm606_vm6, %v605_v38, %v603_v37 }
  0xbe   : > { %821 = vmatmul.msk.f32.vlgmr.msra.gmra.mxu0 %vm608_vm7, %v607_v39 }
 0x13b   : > { %v628_v42 = vpop.f32.mrf.mxu0 }
 0x13c   : > { %v629_v43 = vadd.f32 %v628_v42, %v568_v41 }
 0x13e   : > { %v631_v44 = vmax.f32 %v629_v43, 0.0 }
 0x140   : > { %823 = vmatmul.msk.f32.vlgmr.msra.gmra.mxu1 %vm634_vm9, %v631_v44 }
 0x1bd   : > { %v659_v47 = vpop.f32.mrf.mxu1 }
 0x1be   : > { %v660_v48 = vadd.f32 %v659_v47, %v633_v46 }
 0x1c0   : > { %v662_v49 = vmax.f32 %v660_v48, 0.0 }
 0x1c2   : > { %825 = vmatmul.msk.f32.vlgmr.msra.gmra.mxu2 %vm634_vm9, %v662_v49 }
 0x245   : > { %v688_v52 = vpop.f32.mrf.mxu2 }
 0x246   : > { %v689_v53 = vadd.f32 %v688_v52, %v664_v51 }
 0x248   : > { %v691_v54 = vmax.f32 %v689_v53, 0.0 }
 0x24a   : > { %827 = vmatmul.msk.f32.vlgmr.msra.gmra.mxu3 %vm634_vm9, %v691_v54 }
 0x2cd   : > { %v717_v56 = vpop.f32.mrf.mxu3 }
 0x2ce   : > { %v718_v57 = vadd.f32 %v717_v56, %v693_v55 }
 0x2d0   : > { %721 = vst.msk [vmem:[%s367_s25] sm:$0x1] %vm720_vm10, %v718_v57 }
 0x2d1   : > { %952 = shalt.err (!%p949_p13)
}
 0x2d2   : > { %833 = dma.vmem_to_hbm [thread:$0]  (%p1112_p9), %s734_s29, 16, %s736_s15, %s723_s20  }
 0x2d3 PF: > { %s1320_s13 = sld [smem:[#allocation9_spill]]  ;;  %p840_p0 = pnand %p815_p12, %p1119_p11 }
 0x2d5   : > { %p841_p1 = pneg %p840_p0 }
 0x2d9   : > { %s747_s17 = sand.u32 1, %s1320_s13  }
 0x2da   : > { %s748_s19 = scalar_lea.sflag [#allocation5], %s747_s17 }
 0x2db   : > { %982 = dma.done.wait (%p841_p1), %s748_s19, 16  }
 0x2dc   : > { %984 = vsyncadd (%p841_p1), %s748_s19, 4294967280  ;;  %s25_s14 = sadd.s32 1, %s1007_s14   ;;  %s1321_s21 = sld [smem:[#allocation12_spill]] }
 0x2dd   : > { %p22_p2 = scmp.ge.s32.totalorder %s25_s14, 4   ;;  %s1322_s12 = sld [smem:[#allocation10_spill]] }
 0x2de   : > { %s1323_s13 = sld [smem:[#allocation11_spill]]  ;;  %s1324_s30 = smov %s991_s10 }
 0x2df   : > { %s1325_s10 = smov %s995_s11  ;;  %24 = sbr.rel (!%p22_p2) target bundleno = 6 (0x6), region = 109 }
 0x2e2   : > { %s1326_s11 = smov %s1321_s21 }
 0x2e4   :  { %753 = vsyncpa [#allocation4], 1 }
 0x2e5   :  { %755 = vsyncpa [#allocation4 + $0x1], 1 }
 0x2e6   :  { %756 = vsyncpa [#allocation5], 1 }
 0x2e7   :  { %758 = vsyncpa [#allocation5 + $0x1], 1 }

</bundles_post_ra>
